<compile_context>
chip_gen: v7x
topology: tpu7x:2x2x1
jax: 0.10.0
libtpu: 0.0.40
codegen_flags: <defaults>
</compile_context>

<pallas_src>
import functools

import jax
import jax.numpy as jnp
from jax.experimental import pallas as pl
from jax.experimental.pallas import tpu as pltpu


def lstm_kernel(tok_ref, emb_proj_ref, whh_ref, h_out_ref, xg_ref):
    """Fused pre-projected-embedding gather + batched LSTM recurrence.

    tok_ref      : (B_total*S,) int32 SMEM  (scalar-prefetched token ids, [b, t] row-major)
    emb_proj_ref : (V, 4H)  f32  VMEM  (frozen emb @ W_ih^T + b_ih + b_hh, gates [i,f,g,o])
    whh_ref      : (H, 4H)  bf16 VMEM  (W_hh^T)
    h_out_ref    : (Bt, H)  f32  VMEM  (final hidden states for this batch tile)
    xg_ref       : (S*Bt, 4H) f32 VMEM scratch (gathered input projections, t-major)
    """
    tile = pl.program_id(0)
    Bt, H = h_out_ref.shape
    S = xg_ref.shape[0] // Bt
    V = emb_proj_ref.shape[0]

    # Lane-dense gather of pre-projected embedding rows: one (1, 4H) = (1, 128)
    # row per token (no 16-lane masked stores, no in-kernel input matmul).
    for r in range(Bt):                                   # static -> fully unrolled
        for t in range(S):
            tok = tok_ref[(tile * Bt + r) * S + t]
            tok = jnp.minimum(jnp.maximum(tok, 0), V - 1)  # VMEM has no bounds check
            xg_ref[pl.ds(t * Bt + r, 1), :] = emb_proj_ref[pl.ds(tok, 1), :]

    whh = whh_ref[...]                                    # (H, 4H) bf16, loaded once
    # TODO(synk): pltpu.matmul_push_rhs could pin W_hh^T in the MXU weight
    # registers across the 8 serial steps; plain bf16 jnp.dot is used here for
    # portability / lowering safety across v5e/v6e/v7x.

    h = jnp.zeros((Bt, H), jnp.float32)
    c = jnp.zeros((Bt, H), jnp.float32)
    for t in range(S):                                    # fully unrolled recurrence
        x_t = xg_ref[pl.ds(t * Bt, Bt), :]                # (Bt, 4H) f32, static offset
        gates = x_t + jnp.dot(h.astype(jnp.bfloat16), whh,
                              preferred_element_type=jnp.float32)  # (Bt, 4H)
        sig = jax.nn.sigmoid(gates)                       # full-width EUP push
        tg = jnp.tanh(gates)                              # full-width EUP push
        i_g = sig[:, 0 * H:1 * H]
        f_g = sig[:, 1 * H:2 * H]
        g_g = tg[:, 2 * H:3 * H]
        o_g = sig[:, 3 * H:4 * H]
        c = f_g * c + i_g * g_g
        h = o_g * jnp.tanh(c)

    h_out_ref[...] = h


def prepare_lstm_params(emb_table, w_ih, w_hh, b_ih, b_hh):
    """One-time frozen-weight layout prep (NOT part of the per-call path)."""
    emb = jnp.asarray(emb_table, jnp.float32)                     # (V, E)
    wih_t = jnp.asarray(w_ih, jnp.float32).T                      # (E, 4H)
    bias = (jnp.asarray(b_ih, jnp.float32)
            + jnp.asarray(b_hh, jnp.float32)).reshape(1, -1)      # (1, 4H)
    # Fold embedding lookup + input projection + bias into one lane-dense table.
    emb_proj = emb @ wih_t + bias                                 # (V, 4H) f32
    # Recurrent weights in bf16: single-pass MXU matmuls on the serial chain.
    whh_t = jnp.asarray(w_hh, jnp.float32).T.astype(jnp.bfloat16)  # (H, 4H)
    return emb_proj, whh_t


@functools.partial(jax.jit, static_argnames=("batch_tile",))
def lstm_model_forward(token_ids, emb_proj, whh_t, batch_tile=8):
    """token_ids: (B, S) int32.  B=1 reproduces the PyTorch forward exactly;
    B>1 runs independent sequences batched through a single pallas_call."""
    B, S = token_ids.shape
    V, G = emb_proj.shape                                   # G = 4H
    H = whh_t.shape[0]

    bt = min(batch_tile, B)                                 # batch tile size
    n_tiles = pl.cdiv(B, bt)
    Bp = n_tiles * bt
    tok = token_ids.astype(jnp.int32)
    if Bp != B:                                             # pad batch to a tile multiple
        tok = jnp.concatenate([tok, jnp.zeros((Bp - B, S), jnp.int32)], axis=0)
    tok_flat = tok.reshape(Bp * S)

    grid_spec = pltpu.PrefetchScalarGridSpec(
        num_scalar_prefetch=1,                              # token ids land in SMEM
        grid=(n_tiles,),                                    # batch tiles
        in_specs=[
            pl.BlockSpec((V, G), lambda i, tok: (0, 0)),    # emb_proj: constant block,
            pl.BlockSpec((H, G), lambda i, tok: (0, 0)),    # W_hh^T : DMA'd once, resident
        ],
        out_specs=pl.BlockSpec((bt, H), lambda i, tok: (i, 0)),
        scratch_shapes=[pltpu.VMEM((S * bt, G), jnp.float32)],
    )
    out = pl.pallas_call(
        lstm_kernel,
        out_shape=jax.ShapeDtypeStruct((Bp, H), jnp.float32),
        grid_spec=grid_spec,
        compiler_params=pltpu.CompilerParams(
            dimension_semantics=("parallel",),              # independent batch tiles
        ),
    )(tok_flat, emb_proj, whh_t)
    return out[:B]                                          # (B, H)


def lstm_reference(token_ids, emb_table, w_ih, w_hh, b_ih, b_hh, hidden_dim):
    """Pure-JAX f32 reference matching torch.nn.LSTM gate equations, per row."""
    H = hidden_dim

    def one_seq(tokens):
        embeds = jnp.take(emb_table, tokens, axis=0).astype(jnp.float32)

        def step(carry, x):
            h, c = carry
            gates = x @ w_ih.T + b_ih + h @ w_hh.T + b_hh
            i_g = jax.nn.sigmoid(gates[0 * H:1 * H])
            f_g = jax.nn.sigmoid(gates[1 * H:2 * H])
            g_g = jnp.tanh(gates[2 * H:3 * H])
            o_g = jax.nn.sigmoid(gates[3 * H:4 * H])
            c_new = f_g * c + i_g * g_g
            h_new = o_g * jnp.tanh(c_new)
            return (h_new, c_new), h_new

        (h_final, _), _ = jax.lax.scan(
            step,
            (jnp.zeros((H,), jnp.float32), jnp.zeros((H,), jnp.float32)),
            embeds,
        )
        return h_final

    return jax.vmap(one_seq)(token_ids)                    # (B, H)


if __name__ == "__main__":
    # Small shapes consistent with the module's forward.
    vocab_size = 50
    embedding_dim = 16
    hidden_dim = 32
    seq_len = 8

    key = jax.random.PRNGKey(0)
    k_emb, k_wih, k_whh, k_bih, k_bhh, k_tok, k_tokb = jax.random.split(key, 7)

    # Deterministic parameter init (shapes follow torch.nn.Embedding / torch.nn.LSTM).
    bound = 1.0 / jnp.sqrt(hidden_dim)
    emb_table = jax.random.normal(k_emb, (vocab_size, embedding_dim), jnp.float32)
    w_ih = jax.random.uniform(k_wih, (4 * hidden_dim, embedding_dim), jnp.float32, -bound, bound)
    w_hh = jax.random.uniform(k_whh, (4 * hidden_dim, hidden_dim), jnp.float32, -bound, bound)
    b_ih = jax.random.uniform(k_bih, (4 * hidden_dim,), jnp.float32, -bound, bound)
    b_hh = jax.random.uniform(k_bhh, (4 * hidden_dim,), jnp.float32, -bound, bound)

    # One-time layout prep (frozen weights) -- not part of the per-call path.
    emb_proj, whh_t = prepare_lstm_params(emb_table, w_ih, w_hh, b_ih, b_hh)
    emb_proj, whh_t = jax.block_until_ready((emb_proj, whh_t))

    # --- Module-faithful call: one (1, S) sequence -> (1, H) final hidden state.
    token_ids = jax.random.randint(k_tok, (1, seq_len), 0, vocab_size, jnp.int32)
    out = jax.block_until_ready(lstm_model_forward(token_ids, emb_proj, whh_t))
    ref = lstm_reference(token_ids, emb_table, w_ih, w_hh, b_ih, b_hh, hidden_dim)
    assert out.shape == (1, hidden_dim)
    assert jnp.allclose(out, ref, atol=1e-2, rtol=1e-2), "batch=1 mismatch vs reference"

    # --- Batched call: 16 independent sequences -> grid=(2,) parallel batch tiles of 8.
    token_ids_b = jax.random.randint(k_tokb, (16, seq_len), 0, vocab_size, jnp.int32)
    out_b = jax.block_until_ready(lstm_model_forward(token_ids_b, emb_proj, whh_t))
    ref_b = lstm_reference(token_ids_b, emb_table, w_ih, w_hh, b_ih, b_hh, hidden_dim)
    assert out_b.shape == (16, hidden_dim)
    assert jnp.allclose(out_b, ref_b, atol=1e-2, rtol=1e-2), "batched mismatch vs reference"

    print("KERNEL_OK")
</pallas_src>

<mosaic_0001>
module attributes {stable_mosaic.version = 11 : i64} {
  func.func @lstm_kernel(%arg0: i32, %arg1: memref<8xi32, #tpu.memory_space<smem>>, %arg2: memref<50x128xf32, #tpu.memory_space<vmem>>, %arg3: memref<32x128xbf16, #tpu.memory_space<vmem>>, %arg4: memref<1x32xf32, #tpu.memory_space<vmem>>, %arg5: memref<8x128xf32, #tpu.memory_space<vmem>>) attributes {dimension_semantics = [#tpu.dimension_semantics<parallel>], iteration_bounds = array<i64: 1>, scalar_prefetch = 1 : i64, scratch_operands = 1 : i64, tpu.core_type = #tpu.core_type<tc>, window_params = [{pipeline_mode = #tpu.pipeline_mode<synchronous>, transform_indices = @transform_0, window_bounds = array<i64: 50, 128>}, {pipeline_mode = #tpu.pipeline_mode<synchronous>, transform_indices = @transform_1, window_bounds = array<i64: 32, 128>}, {transform_indices = @transform_2, window_bounds = array<i64: 1, 32>}]} {
    %c1_i32 = arith.constant 1 : i32
    %0 = arith.muli %arg0, %c1_i32 : i32
    %c0_i32 = arith.constant 0 : i32
    %1 = arith.addi %0, %c0_i32 : i32
    %c8_i32 = arith.constant 8 : i32
    %2 = arith.muli %1, %c8_i32 : i32
    %c0_i32_0 = arith.constant 0 : i32
    %3 = arith.addi %2, %c0_i32_0 : i32
    %4 = arith.index_cast %3 : i32 to index
    %5 = memref.load %arg1[%4] : memref<8xi32, #tpu.memory_space<smem>>
    %c0_i32_1 = arith.constant 0 : i32
    %6 = arith.maxsi %5, %c0_i32_1 : i32
    %c49_i32 = arith.constant 49 : i32
    %7 = arith.minsi %6, %c49_i32 : i32
    %8 = arith.index_cast %7 : i32 to index
    %c0 = arith.constant 0 : index
    %9 = vector.load %arg2[%8, %c0] : memref<50x128xf32, #tpu.memory_space<vmem>>, vector<1x128xf32>
    %c0_2 = arith.constant 0 : index
    %c0_3 = arith.constant 0 : index
    %10 = vector.load %arg5[%c0_2, %c0_3] : memref<8x128xf32, #tpu.memory_space<vmem>>, vector<1x128xf32>
    tpu.vector_store %arg5[%c0_2, %c0_3], %9 {strides = array<i32>} : memref<8x128xf32, #tpu.memory_space<vmem>>, vector<1x128xf32>,
    %c1_i32_4 = arith.constant 1 : i32
    %11 = arith.muli %arg0, %c1_i32_4 : i32
    %c0_i32_5 = arith.constant 0 : i32
    %12 = arith.addi %11, %c0_i32_5 : i32
    %c8_i32_6 = arith.constant 8 : i32
    %13 = arith.muli %12, %c8_i32_6 : i32
    %c1_i32_7 = arith.constant 1 : i32
    %14 = arith.addi %13, %c1_i32_7 : i32
    %15 = arith.index_cast %14 : i32 to index
    %16 = memref.load %arg1[%15] : memref<8xi32, #tpu.memory_space<smem>>
    %c0_i32_8 = arith.constant 0 : i32
    %17 = arith.maxsi %16, %c0_i32_8 : i32
    %c49_i32_9 = arith.constant 49 : i32
    %18 = arith.minsi %17, %c49_i32_9 : i32
    %19 = arith.index_cast %18 : i32 to index
    %c0_10 = arith.constant 0 : index
    %20 = vector.load %arg2[%19, %c0_10] : memref<50x128xf32, #tpu.memory_space<vmem>>, vector<1x128xf32>
    %c1 = arith.constant 1 : index
    %c0_11 = arith.constant 0 : index
    %21 = vector.load %arg5[%c1, %c0_11] : memref<8x128xf32, #tpu.memory_space<vmem>>, vector<1x128xf32>
    tpu.vector_store %arg5[%c1, %c0_11], %20 {strides = array<i32>} : memref<8x128xf32, #tpu.memory_space<vmem>>, vector<1x128xf32>,
    %c1_i32_12 = arith.constant 1 : i32
    %22 = arith.muli %arg0, %c1_i32_12 : i32
    %c0_i32_13 = arith.constant 0 : i32
    %23 = arith.addi %22, %c0_i32_13 : i32
    %c8_i32_14 = arith.constant 8 : i32
    %24 = arith.muli %23, %c8_i32_14 : i32
    %c2_i32 = arith.constant 2 : i32
    %25 = arith.addi %24, %c2_i32 : i32
    %26 = arith.index_cast %25 : i32 to index
    %27 = memref.load %arg1[%26] : memref<8xi32, #tpu.memory_space<smem>>
    %c0_i32_15 = arith.constant 0 : i32
    %28 = arith.maxsi %27, %c0_i32_15 : i32
    %c49_i32_16 = arith.constant 49 : i32
    %29 = arith.minsi %28, %c49_i32_16 : i32
    %30 = arith.index_cast %29 : i32 to index
    %c0_17 = arith.constant 0 : index
    %31 = vector.load %arg2[%30, %c0_17] : memref<50x128xf32, #tpu.memory_space<vmem>>, vector<1x128xf32>
    %c2 = arith.constant 2 : index
    %c0_18 = arith.constant 0 : index
    %32 = vector.load %arg5[%c2, %c0_18] : memref<8x128xf32, #tpu.memory_space<vmem>>, vector<1x128xf32>
    tpu.vector_store %arg5[%c2, %c0_18], %31 {strides = array<i32>} : memref<8x128xf32, #tpu.memory_space<vmem>>, vector<1x128xf32>,
    %c1_i32_19 = arith.constant 1 : i32
    %33 = arith.muli %arg0, %c1_i32_19 : i32
    %c0_i32_20 = arith.constant 0 : i32
    %34 = arith.addi %33, %c0_i32_20 : i32
    %c8_i32_21 = arith.constant 8 : i32
    %35 = arith.muli %34, %c8_i32_21 : i32
    %c3_i32 = arith.constant 3 : i32
    %36 = arith.addi %35, %c3_i32 : i32
    %37 = arith.index_cast %36 : i32 to index
    %38 = memref.load %arg1[%37] : memref<8xi32, #tpu.memory_space<smem>>
    %c0_i32_22 = arith.constant 0 : i32
    %39 = arith.maxsi %38, %c0_i32_22 : i32
    %c49_i32_23 = arith.constant 49 : i32
    %40 = arith.minsi %39, %c49_i32_23 : i32
    %41 = arith.index_cast %40 : i32 to index
    %c0_24 = arith.constant 0 : index
    %42 = vector.load %arg2[%41, %c0_24] : memref<50x128xf32, #tpu.memory_space<vmem>>, vector<1x128xf32>
    %c3 = arith.constant 3 : index
    %c0_25 = arith.constant 0 : index
    %43 = vector.load %arg5[%c3, %c0_25] : memref<8x128xf32, #tpu.memory_space<vmem>>, vector<1x128xf32>
    tpu.vector_store %arg5[%c3, %c0_25], %42 {strides = array<i32>} : memref<8x128xf32, #tpu.memory_space<vmem>>, vector<1x128xf32>,
    %c1_i32_26 = arith.constant 1 : i32
    %44 = arith.muli %arg0, %c1_i32_26 : i32
    %c0_i32_27 = arith.constant 0 : i32
    %45 = arith.addi %44, %c0_i32_27 : i32
    %c8_i32_28 = arith.constant 8 : i32
    %46 = arith.muli %45, %c8_i32_28 : i32
    %c4_i32 = arith.constant 4 : i32
    %47 = arith.addi %46, %c4_i32 : i32
    %48 = arith.index_cast %47 : i32 to index
    %49 = memref.load %arg1[%48] : memref<8xi32, #tpu.memory_space<smem>>
    %c0_i32_29 = arith.constant 0 : i32
    %50 = arith.maxsi %49, %c0_i32_29 : i32
    %c49_i32_30 = arith.constant 49 : i32
    %51 = arith.minsi %50, %c49_i32_30 : i32
    %52 = arith.index_cast %51 : i32 to index
    %c0_31 = arith.constant 0 : index
    %53 = vector.load %arg2[%52, %c0_31] : memref<50x128xf32, #tpu.memory_space<vmem>>, vector<1x128xf32>
    %c4 = arith.constant 4 : index
    %c0_32 = arith.constant 0 : index
    %54 = vector.load %arg5[%c4, %c0_32] : memref<8x128xf32, #tpu.memory_space<vmem>>, vector<1x128xf32>
    tpu.vector_store %arg5[%c4, %c0_32], %53 {strides = array<i32>} : memref<8x128xf32, #tpu.memory_space<vmem>>, vector<1x128xf32>,
    %c1_i32_33 = arith.constant 1 : i32
    %55 = arith.muli %arg0, %c1_i32_33 : i32
    %c0_i32_34 = arith.constant 0 : i32
    %56 = arith.addi %55, %c0_i32_34 : i32
    %c8_i32_35 = arith.constant 8 : i32
    %57 = arith.muli %56, %c8_i32_35 : i32
    %c5_i32 = arith.constant 5 : i32
    %58 = arith.addi %57, %c5_i32 : i32
    %59 = arith.index_cast %58 : i32 to index
    %60 = memref.load %arg1[%59] : memref<8xi32, #tpu.memory_space<smem>>
    %c0_i32_36 = arith.constant 0 : i32
    %61 = arith.maxsi %60, %c0_i32_36 : i32
    %c49_i32_37 = arith.constant 49 : i32
    %62 = arith.minsi %61, %c49_i32_37 : i32
    %63 = arith.index_cast %62 : i32 to index
    %c0_38 = arith.constant 0 : index
    %64 = vector.load %arg2[%63, %c0_38] : memref<50x128xf32, #tpu.memory_space<vmem>>, vector<1x128xf32>
    %c5 = arith.constant 5 : index
    %c0_39 = arith.constant 0 : index
    %65 = vector.load %arg5[%c5, %c0_39] : memref<8x128xf32, #tpu.memory_space<vmem>>, vector<1x128xf32>
    tpu.vector_store %arg5[%c5, %c0_39], %64 {strides = array<i32>} : memref<8x128xf32, #tpu.memory_space<vmem>>, vector<1x128xf32>,
    %c1_i32_40 = arith.constant 1 : i32
    %66 = arith.muli %arg0, %c1_i32_40 : i32
    %c0_i32_41 = arith.constant 0 : i32
    %67 = arith.addi %66, %c0_i32_41 : i32
    %c8_i32_42 = arith.constant 8 : i32
    %68 = arith.muli %67, %c8_i32_42 : i32
    %c6_i32 = arith.constant 6 : i32
    %69 = arith.addi %68, %c6_i32 : i32
    %70 = arith.index_cast %69 : i32 to index
    %71 = memref.load %arg1[%70] : memref<8xi32, #tpu.memory_space<smem>>
    %c0_i32_43 = arith.constant 0 : i32
    %72 = arith.maxsi %71, %c0_i32_43 : i32
    %c49_i32_44 = arith.constant 49 : i32
    %73 = arith.minsi %72, %c49_i32_44 : i32
    %74 = arith.index_cast %73 : i32 to index
    %c0_45 = arith.constant 0 : index
    %75 = vector.load %arg2[%74, %c0_45] : memref<50x128xf32, #tpu.memory_space<vmem>>, vector<1x128xf32>
    %c6 = arith.constant 6 : index
    %c0_46 = arith.constant 0 : index
    %76 = vector.load %arg5[%c6, %c0_46] : memref<8x128xf32, #tpu.memory_space<vmem>>, vector<1x128xf32>
    tpu.vector_store %arg5[%c6, %c0_46], %75 {strides = array<i32>} : memref<8x128xf32, #tpu.memory_space<vmem>>, vector<1x128xf32>,
    %c1_i32_47 = arith.constant 1 : i32
    %77 = arith.muli %arg0, %c1_i32_47 : i32
    %c0_i32_48 = arith.constant 0 : i32
    %78 = arith.addi %77, %c0_i32_48 : i32
    %c8_i32_49 = arith.constant 8 : i32
    %79 = arith.muli %78, %c8_i32_49 : i32
    %c7_i32 = arith.constant 7 : i32
    %80 = arith.addi %79, %c7_i32 : i32
    %81 = arith.index_cast %80 : i32 to index
    %82 = memref.load %arg1[%81] : memref<8xi32, #tpu.memory_space<smem>>
    %c0_i32_50 = arith.constant 0 : i32
    %83 = arith.maxsi %82, %c0_i32_50 : i32
    %c49_i32_51 = arith.constant 49 : i32
    %84 = arith.minsi %83, %c49_i32_51 : i32
    %85 = arith.index_cast %84 : i32 to index
    %c0_52 = arith.constant 0 : index
    %86 = vector.load %arg2[%85, %c0_52] : memref<50x128xf32, #tpu.memory_space<vmem>>, vector<1x128xf32>
    %c7 = arith.constant 7 : index
    %c0_53 = arith.constant 0 : index
    %87 = vector.load %arg5[%c7, %c0_53] : memref<8x128xf32, #tpu.memory_space<vmem>>, vector<1x128xf32>
    tpu.vector_store %arg5[%c7, %c0_53], %86 {strides = array<i32>} : memref<8x128xf32, #tpu.memory_space<vmem>>, vector<1x128xf32>,
    %c0_54 = arith.constant 0 : index
    %c0_55 = arith.constant 0 : index
    %88 = vector.load %arg3[%c0_54, %c0_55] : memref<32x128xbf16, #tpu.memory_space<vmem>>, vector<32x128xbf16>
    %cst = arith.constant 0.000000e+00 : f32
    %89 = vector.broadcast %cst : f32 to vector<1x32xf32>
    %cst_56 = arith.constant 0.000000e+00 : f32
    %90 = vector.broadcast %cst_56 : f32 to vector<1x32xf32>
    %c0_57 = arith.constant 0 : index
    %c0_58 = arith.constant 0 : index
    %91 = vector.load %arg5[%c0_57, %c0_58] : memref<8x128xf32, #tpu.memory_space<vmem>>, vector<1x128xf32>
    %92 = arith.truncf %89 : vector<1x32xf32> to vector<1x32xbf16>
    %cst_59 = arith.constant dense<0.000000e+00> : vector<1x128xf32>
    %93 = tpu.matmul %92, %88, %cst_59 {dimension_numbers = #tpu.dot_dimension_numbers<[1], [0], [0], [1], [0, 0, 1, 1], [], []>} : vector<1x32xbf16>, vector<32x128xbf16>, vector<1x128xf32> -> vector<1x128xf32>
    %94 = arith.addf %91, %93 : vector<1x128xf32>
    %95 = arith.negf %94 : vector<1x128xf32>
    %96 = math.exp %95 : vector<1x128xf32>
    %cst_60 = arith.constant 1.000000e+00 : f32
    %97 = vector.broadcast %cst_60 : f32 to vector<1x128xf32>
    %98 = arith.addf %97, %96 : vector<1x128xf32>
    %99 = arith.divf %97, %98 : vector<1x128xf32>
    %100 = math.tanh %94 : vector<1x128xf32>
    %101 = vector.extract_strided_slice %99 {offsets = [0, 0], sizes = [1, 32], strides = [1, 1]} : vector<1x128xf32> to vector<1x32xf32>
    %102 = vector.extract_strided_slice %99 {offsets = [0, 32], sizes = [1, 32], strides = [1, 1]} : vector<1x128xf32> to vector<1x32xf32>
    %103 = vector.extract_strided_slice %100 {offsets = [0, 64], sizes = [1, 32], strides = [1, 1]} : vector<1x128xf32> to vector<1x32xf32>
    %104 = vector.extract_strided_slice %99 {offsets = [0, 96], sizes = [1, 32], strides = [1, 1]} : vector<1x128xf32> to vector<1x32xf32>
    %105 = arith.mulf %102, %90 : vector<1x32xf32>
    %106 = arith.mulf %101, %103 : vector<1x32xf32>
    %107 = arith.addf %105, %106 : vector<1x32xf32>
    %108 = math.tanh %107 : vector<1x32xf32>
    %109 = arith.mulf %104, %108 : vector<1x32xf32>
    %c1_61 = arith.constant 1 : index
    %c0_62 = arith.constant 0 : index
    %110 = vector.load %arg5[%c1_61, %c0_62] : memref<8x128xf32, #tpu.memory_space<vmem>>, vector<1x128xf32>
    %111 = arith.truncf %109 : vector<1x32xf32> to vector<1x32xbf16>
    %cst_63 = arith.constant dense<0.000000e+00> : vector<1x128xf32>
    %112 = tpu.matmul %111, %88, %cst_63 {dimension_numbers = #tpu.dot_dimension_numbers<[1], [0], [0], [1], [0, 0, 1, 1], [], []>} : vector<1x32xbf16>, vector<32x128xbf16>, vector<1x128xf32> -> vector<1x128xf32>
    %113 = arith.addf %110, %112 : vector<1x128xf32>
    %114 = arith.negf %113 : vector<1x128xf32>
    %115 = math.exp %114 : vector<1x128xf32>
    %cst_64 = arith.constant 1.000000e+00 : f32
    %116 = vector.broadcast %cst_64 : f32 to vector<1x128xf32>
    %117 = arith.addf %116, %115 : vector<1x128xf32>
    %118 = arith.divf %116, %117 : vector<1x128xf32>
    %119 = math.tanh %113 : vector<1x128xf32>
    %120 = vector.extract_strided_slice %118 {offsets = [0, 0], sizes = [1, 32], strides = [1, 1]} : vector<1x128xf32> to vector<1x32xf32>
    %121 = vector.extract_strided_slice %118 {offsets = [0, 32], sizes = [1, 32], strides = [1, 1]} : vector<1x128xf32> to vector<1x32xf32>
    %122 = vector.extract_strided_slice %119 {offsets = [0, 64], sizes = [1, 32], strides = [1, 1]} : vector<1x128xf32> to vector<1x32xf32>
    %123 = vector.extract_strided_slice %118 {offsets = [0, 96], sizes = [1, 32], strides = [1, 1]} : vector<1x128xf32> to vector<1x32xf32>
    %124 = arith.mulf %121, %107 : vector<1x32xf32>
    %125 = arith.mulf %120, %122 : vector<1x32xf32>
    %126 = arith.addf %124, %125 : vector<1x32xf32>
    %127 = math.tanh %126 : vector<1x32xf32>
    %128 = arith.mulf %123, %127 : vector<1x32xf32>
    %c2_65 = arith.constant 2 : index
    %c0_66 = arith.constant 0 : index
    %129 = vector.load %arg5[%c2_65, %c0_66] : memref<8x128xf32, #tpu.memory_space<vmem>>, vector<1x128xf32>
    %130 = arith.truncf %128 : vector<1x32xf32> to vector<1x32xbf16>
    %cst_67 = arith.constant dense<0.000000e+00> : vector<1x128xf32>
    %131 = tpu.matmul %130, %88, %cst_67 {dimension_numbers = #tpu.dot_dimension_numbers<[1], [0], [0], [1], [0, 0, 1, 1], [], []>} : vector<1x32xbf16>, vector<32x128xbf16>, vector<1x128xf32> -> vector<1x128xf32>
    %132 = arith.addf %129, %131 : vector<1x128xf32>
    %133 = arith.negf %132 : vector<1x128xf32>
    %134 = math.exp %133 : vector<1x128xf32>
    %cst_68 = arith.constant 1.000000e+00 : f32
    %135 = vector.broadcast %cst_68 : f32 to vector<1x128xf32>
    %136 = arith.addf %135, %134 : vector<1x128xf32>
    %137 = arith.divf %135, %136 : vector<1x128xf32>
    %138 = math.tanh %132 : vector<1x128xf32>
    %139 = vector.extract_strided_slice %137 {offsets = [0, 0], sizes = [1, 32], strides = [1, 1]} : vector<1x128xf32> to vector<1x32xf32>
    %140 = vector.extract_strided_slice %137 {offsets = [0, 32], sizes = [1, 32], strides = [1, 1]} : vector<1x128xf32> to vector<1x32xf32>
    %141 = vector.extract_strided_slice %138 {offsets = [0, 64], sizes = [1, 32], strides = [1, 1]} : vector<1x128xf32> to vector<1x32xf32>
    %142 = vector.extract_strided_slice %137 {offsets = [0, 96], sizes = [1, 32], strides = [1, 1]} : vector<1x128xf32> to vector<1x32xf32>
    %143 = arith.mulf %140, %126 : vector<1x32xf32>
    %144 = arith.mulf %139, %141 : vector<1x32xf32>
    %145 = arith.addf %143, %144 : vector<1x32xf32>
    %146 = math.tanh %145 : vector<1x32xf32>
    %147 = arith.mulf %142, %146 : vector<1x32xf32>
    %c3_69 = arith.constant 3 : index
    %c0_70 = arith.constant 0 : index
    %148 = vector.load %arg5[%c3_69, %c0_70] : memref<8x128xf32, #tpu.memory_space<vmem>>, vector<1x128xf32>
    %149 = arith.truncf %147 : vector<1x32xf32> to vector<1x32xbf16>
    %cst_71 = arith.constant dense<0.000000e+00> : vector<1x128xf32>
    %150 = tpu.matmul %149, %88, %cst_71 {dimension_numbers = #tpu.dot_dimension_numbers<[1], [0], [0], [1], [0, 0, 1, 1], [], []>} : vector<1x32xbf16>, vector<32x128xbf16>, vector<1x128xf32> -> vector<1x128xf32>
    %151 = arith.addf %148, %150 : vector<1x128xf32>
    %152 = arith.negf %151 : vector<1x128xf32>
    %153 = math.exp %152 : vector<1x128xf32>
    %cst_72 = arith.constant 1.000000e+00 : f32
    %154 = vector.broadcast %cst_72 : f32 to vector<1x128xf32>
    %155 = arith.addf %154, %153 : vector<1x128xf32>
    %156 = arith.divf %154, %155 : vector<1x128xf32>
    %157 = math.tanh %151 : vector<1x128xf32>
    %158 = vector.extract_strided_slice %156 {offsets = [0, 0], sizes = [1, 32], strides = [1, 1]} : vector<1x128xf32> to vector<1x32xf32>
    %159 = vector.extract_strided_slice %156 {offsets = [0, 32], sizes = [1, 32], strides = [1, 1]} : vector<1x128xf32> to vector<1x32xf32>
    %160 = vector.extract_strided_slice %157 {offsets = [0, 64], sizes = [1, 32], strides = [1, 1]} : vector<1x128xf32> to vector<1x32xf32>
    %161 = vector.extract_strided_slice %156 {offsets = [0, 96], sizes = [1, 32], strides = [1, 1]} : vector<1x128xf32> to vector<1x32xf32>
    %162 = arith.mulf %159, %145 : vector<1x32xf32>
    %163 = arith.mulf %158, %160 : vector<1x32xf32>
    %164 = arith.addf %162, %163 : vector<1x32xf32>
    %165 = math.tanh %164 : vector<1x32xf32>
    %166 = arith.mulf %161, %165 : vector<1x32xf32>
    %c4_73 = arith.constant 4 : index
    %c0_74 = arith.constant 0 : index
    %167 = vector.load %arg5[%c4_73, %c0_74] : memref<8x128xf32, #tpu.memory_space<vmem>>, vector<1x128xf32>
    %168 = arith.truncf %166 : vector<1x32xf32> to vector<1x32xbf16>
    %cst_75 = arith.constant dense<0.000000e+00> : vector<1x128xf32>
    %169 = tpu.matmul %168, %88, %cst_75 {dimension_numbers = #tpu.dot_dimension_numbers<[1], [0], [0], [1], [0, 0, 1, 1], [], []>} : vector<1x32xbf16>, vector<32x128xbf16>, vector<1x128xf32> -> vector<1x128xf32>
    %170 = arith.addf %167, %169 : vector<1x128xf32>
    %171 = arith.negf %170 : vector<1x128xf32>
    %172 = math.exp %171 : vector<1x128xf32>
    %cst_76 = arith.constant 1.000000e+00 : f32
    %173 = vector.broadcast %cst_76 : f32 to vector<1x128xf32>
    %174 = arith.addf %173, %172 : vector<1x128xf32>
    %175 = arith.divf %173, %174 : vector<1x128xf32>
    %176 = math.tanh %170 : vector<1x128xf32>
    %177 = vector.extract_strided_slice %175 {offsets = [0, 0], sizes = [1, 32], strides = [1, 1]} : vector<1x128xf32> to vector<1x32xf32>
    %178 = vector.extract_strided_slice %175 {offsets = [0, 32], sizes = [1, 32], strides = [1, 1]} : vector<1x128xf32> to vector<1x32xf32>
    %179 = vector.extract_strided_slice %176 {offsets = [0, 64], sizes = [1, 32], strides = [1, 1]} : vector<1x128xf32> to vector<1x32xf32>
    %180 = vector.extract_strided_slice %175 {offsets = [0, 96], sizes = [1, 32], strides = [1, 1]} : vector<1x128xf32> to vector<1x32xf32>
    %181 = arith.mulf %178, %164 : vector<1x32xf32>
    %182 = arith.mulf %177, %179 : vector<1x32xf32>
    %183 = arith.addf %181, %182 : vector<1x32xf32>
    %184 = math.tanh %183 : vector<1x32xf32>
    %185 = arith.mulf %180, %184 : vector<1x32xf32>
    %c5_77 = arith.constant 5 : index
    %c0_78 = arith.constant 0 : index
    %186 = vector.load %arg5[%c5_77, %c0_78] : memref<8x128xf32, #tpu.memory_space<vmem>>, vector<1x128xf32>
    %187 = arith.truncf %185 : vector<1x32xf32> to vector<1x32xbf16>
    %cst_79 = arith.constant dense<0.000000e+00> : vector<1x128xf32>
    %188 = tpu.matmul %187, %88, %cst_79 {dimension_numbers = #tpu.dot_dimension_numbers<[1], [0], [0], [1], [0, 0, 1, 1], [], []>} : vector<1x32xbf16>, vector<32x128xbf16>, vector<1x128xf32> -> vector<1x128xf32>
    %189 = arith.addf %186, %188 : vector<1x128xf32>
    %190 = arith.negf %189 : vector<1x128xf32>
    %191 = math.exp %190 : vector<1x128xf32>
    %cst_80 = arith.constant 1.000000e+00 : f32
    %192 = vector.broadcast %cst_80 : f32 to vector<1x128xf32>
    %193 = arith.addf %192, %191 : vector<1x128xf32>
    %194 = arith.divf %192, %193 : vector<1x128xf32>
    %195 = math.tanh %189 : vector<1x128xf32>
    %196 = vector.extract_strided_slice %194 {offsets = [0, 0], sizes = [1, 32], strides = [1, 1]} : vector<1x128xf32> to vector<1x32xf32>
    %197 = vector.extract_strided_slice %194 {offsets = [0, 32], sizes = [1, 32], strides = [1, 1]} : vector<1x128xf32> to vector<1x32xf32>
    %198 = vector.extract_strided_slice %195 {offsets = [0, 64], sizes = [1, 32], strides = [1, 1]} : vector<1x128xf32> to vector<1x32xf32>
    %199 = vector.extract_strided_slice %194 {offsets = [0, 96], sizes = [1, 32], strides = [1, 1]} : vector<1x128xf32> to vector<1x32xf32>
    %200 = arith.mulf %197, %183 : vector<1x32xf32>
    %201 = arith.mulf %196, %198 : vector<1x32xf32>
    %202 = arith.addf %200, %201 : vector<1x32xf32>
    %203 = math.tanh %202 : vector<1x32xf32>
    %204 = arith.mulf %199, %203 : vector<1x32xf32>
    %c6_81 = arith.constant 6 : index
    %c0_82 = arith.constant 0 : index
    %205 = vector.load %arg5[%c6_81, %c0_82] : memref<8x128xf32, #tpu.memory_space<vmem>>, vector<1x128xf32>
    %206 = arith.truncf %204 : vector<1x32xf32> to vector<1x32xbf16>
    %cst_83 = arith.constant dense<0.000000e+00> : vector<1x128xf32>
    %207 = tpu.matmul %206, %88, %cst_83 {dimension_numbers = #tpu.dot_dimension_numbers<[1], [0], [0], [1], [0, 0, 1, 1], [], []>} : vector<1x32xbf16>, vector<32x128xbf16>, vector<1x128xf32> -> vector<1x128xf32>
    %208 = arith.addf %205, %207 : vector<1x128xf32>
    %209 = arith.negf %208 : vector<1x128xf32>
    %210 = math.exp %209 : vector<1x128xf32>
    %cst_84 = arith.constant 1.000000e+00 : f32
    %211 = vector.broadcast %cst_84 : f32 to vector<1x128xf32>
    %212 = arith.addf %211, %210 : vector<1x128xf32>
    %213 = arith.divf %211, %212 : vector<1x128xf32>
    %214 = math.tanh %208 : vector<1x128xf32>
    %215 = vector.extract_strided_slice %213 {offsets = [0, 0], sizes = [1, 32], strides = [1, 1]} : vector<1x128xf32> to vector<1x32xf32>
    %216 = vector.extract_strided_slice %213 {offsets = [0, 32], sizes = [1, 32], strides = [1, 1]} : vector<1x128xf32> to vector<1x32xf32>
    %217 = vector.extract_strided_slice %214 {offsets = [0, 64], sizes = [1, 32], strides = [1, 1]} : vector<1x128xf32> to vector<1x32xf32>
    %218 = vector.extract_strided_slice %213 {offsets = [0, 96], sizes = [1, 32], strides = [1, 1]} : vector<1x128xf32> to vector<1x32xf32>
    %219 = arith.mulf %216, %202 : vector<1x32xf32>
    %220 = arith.mulf %215, %217 : vector<1x32xf32>
    %221 = arith.addf %219, %220 : vector<1x32xf32>
    %222 = math.tanh %221 : vector<1x32xf32>
    %223 = arith.mulf %218, %222 : vector<1x32xf32>
    %c7_85 = arith.constant 7 : index
    %c0_86 = arith.constant 0 : index
    %224 = vector.load %arg5[%c7_85, %c0_86] : memref<8x128xf32, #tpu.memory_space<vmem>>, vector<1x128xf32>
    %225 = arith.truncf %223 : vector<1x32xf32> to vector<1x32xbf16>
    %cst_87 = arith.constant dense<0.000000e+00> : vector<1x128xf32>
    %226 = tpu.matmul %225, %88, %cst_87 {dimension_numbers = #tpu.dot_dimension_numbers<[1], [0], [0], [1], [0, 0, 1, 1], [], []>} : vector<1x32xbf16>, vector<32x128xbf16>, vector<1x128xf32> -> vector<1x128xf32>
    %227 = arith.addf %224, %226 : vector<1x128xf32>
    %228 = arith.negf %227 : vector<1x128xf32>
    %229 = math.exp %228 : vector<1x128xf32>
    %cst_88 = arith.constant 1.000000e+00 : f32
    %230 = vector.broadcast %cst_88 : f32 to vector<1x128xf32>
    %231 = arith.addf %230, %229 : vector<1x128xf32>
    %232 = arith.divf %230, %231 : vector<1x128xf32>
    %233 = math.tanh %227 : vector<1x128xf32>
    %234 = vector.extract_strided_slice %232 {offsets = [0, 0], sizes = [1, 32], strides = [1, 1]} : vector<1x128xf32> to vector<1x32xf32>
    %235 = vector.extract_strided_slice %232 {offsets = [0, 32], sizes = [1, 32], strides = [1, 1]} : vector<1x128xf32> to vector<1x32xf32>
    %236 = vector.extract_strided_slice %233 {offsets = [0, 64], sizes = [1, 32], strides = [1, 1]} : vector<1x128xf32> to vector<1x32xf32>
    %237 = vector.extract_strided_slice %232 {offsets = [0, 96], sizes = [1, 32], strides = [1, 1]} : vector<1x128xf32> to vector<1x32xf32>
    %238 = arith.mulf %235, %221 : vector<1x32xf32>
    %239 = arith.mulf %234, %236 : vector<1x32xf32>
    %240 = arith.addf %238, %239 : vector<1x32xf32>
    %241 = math.tanh %240 : vector<1x32xf32>
    %242 = arith.mulf %237, %241 : vector<1x32xf32>
    %c0_89 = arith.constant 0 : index
    %c0_90 = arith.constant 0 : index
    %243 = vector.load %arg4[%c0_89, %c0_90] : memref<1x32xf32, #tpu.memory_space<vmem>>, vector<1x32xf32>
    tpu.vector_store %arg4[%c0_89, %c0_90], %242 {strides = array<i32>} : memref<1x32xf32, #tpu.memory_space<vmem>>, vector<1x32xf32>,
    return
  }
  func.func @transform_0(%arg0: i32, %arg1: memref<8xi32, #tpu.memory_space<smem>>) -> (i32, i32) {
    %c0_i32 = arith.constant 0 : i32
    %c0_i32_0 = arith.constant 0 : i32
    %c0_i32_1 = arith.constant 0 : i32
    return %c0_i32, %c0_i32_0 : i32, i32
  }
  func.func @transform_1(%arg0: i32, %arg1: memref<8xi32, #tpu.memory_space<smem>>) -> (i32, i32) {
    %c0_i32 = arith.constant 0 : i32
    %c0_i32_0 = arith.constant 0 : i32
    %c0_i32_1 = arith.constant 0 : i32
    return %c0_i32, %c0_i32_0 : i32, i32
  }
  func.func @transform_2(%arg0: i32, %arg1: memref<8xi32, #tpu.memory_space<smem>>) -> (i32, i32) {
    %c0_i32 = arith.constant 0 : i32
    %c0_i32_0 = arith.constant 0 : i32
    return %arg0, %c0_i32 : i32, i32
  }
}

</mosaic_0001>

<bundles_post_ra>
// kernel: lstm_model_forward.1
= control target key start
LH: loop header
LB: loop body
LE: loop exit
PB: predicated region body
PF: predicated region fallthrough
CT: control target
= control target key end

     0   :  { %s1243_s0 = inlined_call_operand.vmem [shape: s32[8], index: 0, kind: input, shape index: {}]   ;;  %s1244_s1 = inlined_call_operand.hbm [shape: f32[50,128], index: 1, kind: input, shape index: {}]   ;;  %s1245_s2 = inlined_call_operand.hbm [shape: bf16[32,128], index: 2, kind: input, shape index: {}]   ;;  %s1246_s3 = inlined_call_operand.hbm [shape: f32[1,32], index: 3, kind: output, shape index: {}]  }
   0x1   :  { %s8_s14 = sshll.u32 %s1243_s0, 4  ;;  %s9_s14 = int_to_ptr.vmem [resolvable:$true] %s8_s14 }
   0x2   :  { %s993_s15 = scalar_lea.vmem %s9_s14, 16  ;;  %p998_p1 = scmp.lt.s32.totalorder %s9_s14, %s9_s14 }
   0x3   :  { %p994_p0 = scmp.ne.s32.totalorder %s9_s14, %s993_s15  ;;  %p999_p2 = scmp.lt.s32.totalorder %s993_s15, %s993_s15 }
   0x5   :  { %p1000_p3 = por %p999_p2, %p998_p1 }
   0x7   :  { %p1001_p4 = pnand %p1000_p3, %p994_p0 }
   0x9   :  { %1004 = shalt.err (!%p1001_p4)  }
   0xa   :  { %s1079_s16 = smov [#allocation4]  }
   0xb   :  { %11 = dma.vmem_to_smem %s9_s14, 16, %s1079_s16, [#allocation3] }
   0xc   :  { %1071 = dma.done.wait [#allocation3], 16 }
   0xd   :  { %1072 = vsyncadd [#allocation3], 4294967280 }
   0xe   :  { %13 = sfence }
   0xf   :  { %14 = vsyncpa [#allocation6], 0 }
  0x10   :  { %15 = vsyncpa [#allocation9], 0 }
  0x11   :  { %16 = vsyncpa [#allocation7], 0  ;;  %s1080_s17 = smov [#allocation5]   ;;  %s1005_s20 = scalar_lea.hbm %s1244_s1, 896 }
  0x12   :  { %s22_s18 = sshll.u32 %s1080_s17, 4  ;;  %p1006_p5 = scmp.ne.s32.totalorder %s1244_s1, %s1005_s20  ;;  %s23_s18 = int_to_ptr.vmem [resolvable:$true] %s22_s18 }
  0x13   :  { %p1009_p6 = scmp.lt.u32.totalorder %s1005_s20, %s1244_s1 }
  0x15   :  { %p1011_p7 = pnand %p1009_p6, %p1006_p5 }
  0x17   :  { %1014 = shalt.err (!%p1011_p7)
}
  0x18   :  { %s1015_s25 = scalar_lea.vmem %s23_s18, 896  ;;  %p1020_p9 = scmp.lt.s32.totalorder %s23_s18, %s23_s18 }
  0x19   :  { %p1016_p8 = scmp.ne.s32.totalorder %s23_s18, %s1015_s25  ;;  %p1021_p10 = scmp.lt.s32.totalorder %s1015_s25, %s1015_s25 }
  0x1b   :  { %p1022_p11 = por %p1021_p10, %p1020_p9 }
  0x1d   :  { %p1023_p12 = pnand %p1022_p11, %p1016_p8 }
  0x1f   :  { %1026 = shalt.err (!%p1023_p12)
}
  0x20   :  { %s1081_s26 = smov 128   ;;  %s1082_s27 = smov 8  }
  0x21   :  { %28 = dma.hbm_to_vmem [thread:$0]  %s1244_s1, 896, %s23_s18, [#allocation6], %s1081_s26, %s1081_s26, %s1082_s27  }
  0x22   :  { %s1083_s30 = smov [#allocation8]   ;;  %s1027_s7 = scalar_lea.hbm %s1245_s2, 256 }
  0x23   :  { %s34_s4 = sshll.u32 %s1083_s30, 4  ;;  %p1028_p13 = scmp.ne.s32.totalorder %s1245_s2, %s1027_s7  ;;  %s35_s4 = int_to_ptr.vmem [resolvable:$true] %s34_s4 }
  0x24   :  { %p1031_p0 = scmp.lt.u32.totalorder %s1027_s7, %s1245_s2 }
  0x26   :  { %p1033_p1 = pnand %p1031_p0, %p1028_p13 }
  0x28   :  { %1036 = shalt.err (!%p1033_p1)
}
  0x29   :  { %s1037_s12 = scalar_lea.vmem %s35_s4, 256  ;;  %p1042_p3 = scmp.lt.s32.totalorder %s35_s4, %s35_s4 }
  0x2a   :  { %p1038_p2 = scmp.ne.s32.totalorder %s35_s4, %s1037_s12  ;;  %p1043_p4 = scmp.lt.s32.totalorder %s1037_s12, %s1037_s12 }
  0x2c   :  { %p1044_p5 = por %p1043_p4, %p1042_p3 }
  0x2e   :  { %p1045_p6 = pnand %p1044_p5, %p1038_p2 }
  0x30   :  { %1048 = shalt.err (!%p1045_p6)
}
  0x31   :  { %s1084_s1 = smov 64   ;;  %s1085_s13 = smov 4  }
  0x32   :  { %40 = dma.hbm_to_vmem [thread:$0]  %s1245_s2, 256, %s35_s4, [#allocation9], %s1084_s1, %s1084_s1, %s1085_s13  }
  0x33   :  { %1073 = dma.done.wait [#allocation6], 896  }
  0x34   :  { %1074 = vsyncadd [#allocation6], 4294966400 }
  0x35   :  { %1075 = dma.done.wait [#allocation9], 256  }
  0x36   :  { %1076 = vsyncadd [#allocation9], 4294967040  ;;  %v1086_v0 = vmov 0.0   ;;  %vm1087_vm0 = vmmov 0   ;;  %s49_s16 = sld [smem:[#allocation4]]  ;;  %v1146_v1 = vld [vmem:[#allocation8] sm:$0xff]  }
  0x37   :  { %851 = vmatprep.subr.bf16.mxu0 %v1086_v0  ;;  %855 = vmatprep.mubr.msk.bf16.mxu0 %vm1087_vm0, %v1086_v0  ;;  %v1149_v2 = vld [vmem:[#allocation8 + $0x8] sm:$0xff]   ;;  %v1088_v4 = vmov 0   ;;  %s1089_s17 = smov 32   ;;  %s752_s18 = sld [smem:[#allocation4 + $0x1]]  ;;  %vm137_vm1 = vcmask 261120   ;;  %vm721_vm2 = vcmask 253952  }
  0x38   :  { %859 = vmatprep.subr.bf16.mxu1 %v1086_v0  ;;  %863 = vmatprep.mubr.msk.bf16.mxu1 %vm1087_vm0, %v1086_v0  ;;  %s758_s19 = sld [smem:[#allocation4 + $0x2]]  ;;  %s764_s21 = sld [smem:[#allocation4 + $0x3]] }
  0x39   :  { %852 = vmatpush3.bf16.msra.mxu0 %v1146_v1  ;;  %860 = vmatpush3.bf16.msra.mxu1 %v1146_v1  ;;  %s770_s23 = sld [smem:[#allocation4 + $0x4]]  ;;  %s776_s25 = sld [smem:[#allocation4 + $0x5]] }
  0x3a   :  { %853 = vmatprep.subr.bf16.mxu0 %v1086_v0  ;;  %861 = vmatprep.subr.bf16.mxu1 %v1086_v0  ;;  %s782_s27 = sld [smem:[#allocation4 + $0x6]]  ;;  %s788_s29 = sld [smem:[#allocation4 + $0x7]] }
  0x3b   :  { %s1090_s4 = smov [#allocation10]  }
  0x3c   :  { %p50_p7 = scmp.gt.s32.totalorder %s49_s16, 0  ;;  %p747_p8 = scmp.lt.s32.totalorder %s49_s16, 49 }
  0x3d   :  { %854 = vmatpush3.bf16.msra.mxu0 %v1149_v2  ;;  %862 = vmatpush3.bf16.msra.mxu1 %v1149_v2  ;;  %p59_p9 = scmp.gt.s32.totalorder %s752_s18, 0  ;;  %p753_p10 = scmp.lt.s32.totalorder %s752_s18, 49 }
  0x3e   :  { %s1248_s16 = smov (!%p50_p7, %s49_s16), 0  ;;  %867 = vmatprep.subr.bf16.mxu0 %v1086_v0  ;;  %875 = vmatprep.subr.bf16.mxu1 %v1086_v0  ;;  %p68_p11 = scmp.gt.s32.totalorder %s758_s19, 0 }
  0x3f   :  { %s1250_s16 = smov (!%p747_p8, %s1248_s16), 49  ;;  %s1252_s18 = smov (!%p59_p9, %s752_s18), 0 }
  0x40   :  { %s54_s2 = scalar_lea.vmem [#allocation5], %s1250_s16  ;;  %856 = vmatmul.mubr.bf16.vlgmr.msra.gmra.mrb[0].mxu0 %v1088_v4  ;;  %s1254_s18 = smov (!%p753_p10, %s1252_s18), 49 }
  0x41   :  { %v55_v3 = vld [vmem:[%s54_s2] sm:$0x1]  ;;  %868 = vmatpush3.bf16.msra.mxu0 %v1146_v1  ;;  %871 = vmatprep.mubr.msk.bf16.mxu0 %vm1087_vm0, %v1086_v0  ;;  %s63_s0 = scalar_lea.vmem [#allocation5], %s1254_s18  ;;  %p759_p12 = scmp.lt.s32.totalorder %s758_s19, 49 }
  0x42   :  { %56 = vst [vmem:[#allocation2] sm:$0x1] %v55_v3  ;;  %869 = vmatprep.subr.bf16.mxu0 %v1086_v0  ;;  %v64_v25 = vld [vmem:[%s63_s0] sm:$0x1]  ;;  %s1256_s19 = smov (!%p68_p11, %s758_s19), 0  ;;  %p77_p13 = scmp.gt.s32.totalorder %s764_s21, 0 }
  0x43   :  { %65 = vst [vmem:[#allocation2 + $0x1] sm:$0x1] %v64_v25  ;;  %s1258_s19 = smov (!%p759_p12, %s1256_s19), 49  ;;  %p765_p0 = scmp.lt.s32.totalorder %s764_s21, 49 }
  0x44   :  { %s72_s20 = scalar_lea.vmem [#allocation5], %s1258_s19  ;;  %s1260_s21 = smov (!%p77_p13, %s764_s21), 0 }
  0x45   :  { %870 = vmatpush3.bf16.msra.mxu0 %v1149_v2  ;;  %v73_v47 = vld [vmem:[%s72_s20] sm:$0x1]  ;;  %s1262_s21 = smov (!%p765_p0, %s1260_s21), 49  ;;  %p86_p1 = scmp.gt.s32.totalorder %s770_s23, 0 }
  0x46   :  { %883 = vmatprep.subr.bf16.mxu0 %v1086_v0  ;;  %74 = vst [vmem:[#allocation2 + $0x2] sm:$0x1] %v73_v47  ;;  %s81_s22 = scalar_lea.vmem [#allocation5], %s1262_s21  ;;  %p771_p2 = scmp.lt.s32.totalorder %s770_s23, 49 }
  0x47   :  { %s1264_s23 = smov (!%p86_p1, %s770_s23), 0  ;;  %p95_p3 = scmp.gt.s32.totalorder %s776_s25, 0 }
  0x48   :  { %s1266_s23 = smov (!%p771_p2, %s1264_s23), 49  ;;  %p777_p4 = scmp.lt.s32.totalorder %s776_s25, 49 }
  0x49   :  { %v124_v5 = vld [vmem:[#allocation2] sm:$0x1]  ;;  %s90_s24 = scalar_lea.vmem [#allocation5], %s1266_s23  ;;  %s1268_s25 = smov (!%p95_p3, %s776_s25), 0 }
  0x4a   :  { %v206_v27 = vld [vmem:[#allocation2 + $0x1] sm:$0x1]  ;;  %s1270_s25 = smov (!%p777_p4, %s1268_s25), 49  ;;  %p104_p5 = scmp.gt.s32.totalorder %s782_s27, 0 }
  0x4b   :  { %s99_s26 = scalar_lea.vmem [#allocation5], %s1270_s25  ;;  %p783_p6 = scmp.lt.s32.totalorder %s782_s27, 49 }
  0x4c   :  { %s1272_s27 = smov (!%p104_p5, %s782_s27), 0  ;;  %p113_p7 = scmp.gt.s32.totalorder %s788_s29, 0 }
  0x4d   :  { %v279_v49 = vld [vmem:[#allocation2 + $0x2] sm:$0x1]  ;;  %s1274_s27 = smov (!%p783_p6, %s1272_s27), 49  ;;  %p789_p8 = scmp.lt.s32.totalorder %s788_s29, 49 }
  0x4e   :  { %s108_s28 = scalar_lea.vmem [#allocation5], %s1274_s27  ;;  %s1276_s29 = smov (!%p113_p7, %s788_s29), 0 }
  0x4f   :  { %s1278_s29 = smov (!%p789_p8, %s1276_s29), 49  ;;  %s729_s5 = sshll.u32 %s1090_s4, 4  ;;  %s730_s5 = int_to_ptr.vmem [resolvable:$true] %s729_s5 }
  0x50   :  { %s117_s30 = scalar_lea.vmem [#allocation5], %s1278_s29  ;;  %s1049_s6 = scalar_lea.vmem %s730_s5, 16 }
  0x51   :  { %p1050_p9 = scmp.ne.s32.totalorder %s730_s5, %s1049_s6  ;;  %s1053_s7 = scalar_lea.vmem %s730_s5, 32 }
  0x52   :  { %p1054_p10 = scmp.lt.s32.totalorder %s730_s5, %s730_s5  ;;  %p1055_p11 = scmp.lt.s32.totalorder %s1053_s7, %s1049_s6 }
  0x54   :  { %p1056_p12 = por %p1055_p11, %p1054_p10 }
  0x56   :  { %p1057_p13 = pnand %p1056_p12, %p1050_p9 }
 0x113   :  { %v175_v6 = vpop.f32.mrb[0].mxu0 }
 0x114   :  { %v181_v7 = vadd.f32 %v175_v6, %v124_v5  ;;  %v857_v8 = vpop.f32.mrb[1].mxu0 }
 0x115   :  { %v178_v9 = vpop.f32.mrb[2].mxu0  ;;  %v82_v8 = vld [vmem:[%s81_s22] sm:$0x1] }
 0x116   :  { %v858_v10 = vpop.f32.mrb[3].mxu0  ;;  %929 = vtanh.f32 %v181_v7  ;;  %v796_v12 = vmul.f32 -1.442695, %v181_v7  ;;  %83 = vst [vmem:[#allocation2 + $0x3] sm:$0x1] %v82_v8 }
 0x118   :  { %931 = vpow2.f32 %v796_v12 }
 0x11d   :  { %v352_v10 = vld [vmem:[#allocation2 + $0x3] sm:$0x1] }
 0x120   :  { %v930_v11 = vpop.eup %929 }
 0x121   :  { %191 = vrot.lane.b32.xlu0 %v930_v11, %s1084_s1 }
 0x122   :  { %v932_v13 = vpop.eup %931 }
 0x123   :  { %v185_v14 = vadd.f32 1.0, %v932_v13 }
 0x125   :  { %933 = vrcp.f32 %v185_v14 }
 0x12f   :  { %v934_v15 = vpop.eup %933 }
 0x130   :  { %v189_v18 = vmul.f32 0.0, %v934_v15 }
 0x193   :  { %v192_v16 = vpop.permute.xlu0 %191 }
 0x194   :  { %v194_v17 = vmul.f32 %v934_v15, %v192_v16 }
 0x196   :  { %196 = vrot.lane.b32.xlu0 %v194_v17, %s1089_s17 }
 0x208   :  { %v197_v19 = vpop.permute.xlu0 %196 }
 0x209   :  { %v199_v20 = vadd.f32 %v197_v19, %v189_v18 }
 0x20b   :  { %935 = vtanh.f32 %v199_v20 }
 0x215   :  { %v936_v21 = vpop.eup %935 }
 0x216   :  { %202 = vrot.lane.b32.xlu1 %v936_v21, %s1084_s1 }
 0x288   :  { %v203_v22 = vpop.permute.xlu1 %202 }
 0x289   :  { %v205_v23 = vmul.f32 %v934_v15, %v203_v22 }
 0x28b   :  { %v207_v24 = vpack.c.bf16 %v205_v23, %v205_v23 }
 0x28d   :  { %209 = vrot.lane.b32.xlu1 %v207_v24, %s1089_s17 }
 0x2ff   :  { %v210_v26 = vpop.permute.xlu1 %209 }
 0x300   :  { %864 = vmatmul.mubr.msk.bf16.vlgmr.msra.gmra.mrb[0].mxu1 %vm137_vm1, %v210_v26 }
 0x301   :  { %876 = vmatpush3.bf16.msra.mxu1 %v1146_v1  ;;  %879 = vmatprep.mubr.msk.bf16.mxu1 %vm1087_vm0, %v1086_v0 }
 0x302   :  { %877 = vmatprep.subr.bf16.mxu1 %v1086_v0 }
 0x305   :  { %878 = vmatpush3.bf16.msra.mxu1 %v1149_v2 }
 0x306   :  { %891 = vmatprep.subr.bf16.mxu1 %v1086_v0 }
 0x3d3   :  { %v248_v28 = vpop.f32.mrb[0].mxu1 }
 0x3d4   :  { %v254_v29 = vadd.f32 %v248_v28, %v206_v27  ;;  %v865_v30 = vpop.f32.mrb[1].mxu1 }
 0x3d5   :  { %v251_v31 = vpop.f32.mrb[2].mxu1  ;;  %v91_v30 = vld [vmem:[%s90_s24] sm:$0x1] }
 0x3d6   :  { %937 = vtanh.f32 %v254_v29  ;;  %v866_v32 = vpop.f32.mrb[3].mxu1  ;;  %v798_v34 = vmul.f32 -1.442695, %v254_v29  ;;  %92 = vst [vmem:[#allocation2 + $0x4] sm:$0x1] %v91_v30 }
 0x3d8   :  { %939 = vpow2.f32 %v798_v34 }
 0x3dd   :  { %v425_v32 = vld [vmem:[#allocation2 + $0x4] sm:$0x1] }
 0x3e0   :  { %v938_v33 = vpop.eup %937 }
 0x3e1   :  { %264 = vrot.lane.b32.xlu0 %v938_v33, %s1084_s1 }
 0x3e2   :  { %v940_v35 = vpop.eup %939 }
 0x3e3   :  { %v258_v36 = vadd.f32 1.0, %v940_v35 }
 0x3e5   :  { %941 = vrcp.f32 %v258_v36 }
 0x3ef   :  { %v942_v37 = vpop.eup %941 }
 0x3f0   :  { %v262_v40 = vmul.f32 %v942_v37, %v199_v20 }
 0x453   :  { %v265_v38 = vpop.permute.xlu0 %264 }
 0x454   :  { %v267_v39 = vmul.f32 %v942_v37, %v265_v38 }
 0x456   :  { %269 = vrot.lane.b32.xlu1 %v267_v39, %s1089_s17 }
 0x4c8   :  { %v270_v41 = vpop.permute.xlu1 %269 }
 0x4c9   :  { %v272_v42 = vadd.f32 %v270_v41, %v262_v40 }
 0x4cb   :  { %943 = vtanh.f32 %v272_v42 }
 0x4d5   :  { %v944_v43 = vpop.eup %943 }
 0x4d6   :  { %275 = vrot.lane.b32.xlu0 %v944_v43, %s1084_s1 }
 0x548   :  { %v276_v44 = vpop.permute.xlu0 %275 }
 0x549   :  { %v278_v45 = vmul.f32 %v942_v37, %v276_v44 }
 0x54b   :  { %v280_v46 = vpack.c.bf16 %v278_v45, %v278_v45 }
 0x54d   :  { %282 = vrot.lane.b32.xlu1 %v280_v46, %s1089_s17 }
 0x5bf   :  { %v283_v48 = vpop.permute.xlu1 %282 }
 0x5c0   :  { %872 = vmatmul.mubr.msk.bf16.vlgmr.msra.gmra.mrb[4].mxu0 %vm137_vm1, %v283_v48 }
 0x5c1   :  { %884 = vmatpush3.bf16.msra.mxu0 %v1146_v1  ;;  %887 = vmatprep.mubr.msk.bf16.mxu0 %vm1087_vm0, %v1086_v0 }
 0x5c2   :  { %885 = vmatprep.subr.bf16.mxu0 %v1086_v0 }
 0x5c5   :  { %886 = vmatpush3.bf16.msra.mxu0 %v1149_v2 }
 0x5c6   :  { %899 = vmatprep.subr.bf16.mxu0 %v1086_v0 }
 0x693   :  { %v321_v50 = vpop.f32.mrb[4].mxu0 }
 0x694   :  { %v327_v51 = vadd.f32 %v321_v50, %v279_v49  ;;  %v873_v52 = vpop.f32.mrb[5].mxu0 }
 0x695   :  { %v324_v53 = vpop.f32.mrb[6].mxu0  ;;  %v100_v52 = vld [vmem:[%s99_s26] sm:$0x1] }
 0x696   :  { %945 = vtanh.f32 %v327_v51  ;;  %v874_v54 = vpop.f32.mrb[7].mxu0  ;;  %v800_v56 = vmul.f32 -1.442695, %v327_v51  ;;  %101 = vst [vmem:[#allocation2 + $0x5] sm:$0x1] %v100_v52 }
 0x698   :  { %947 = vpow2.f32 %v800_v56 }
 0x69d   :  { %v498_v54 = vld [vmem:[#allocation2 + $0x5] sm:$0x1] }
 0x6a0   :  { %v946_v55 = vpop.eup %945 }
 0x6a1   :  { %337 = vrot.lane.b32.xlu0 %v946_v55, %s1084_s1 }
 0x6a2   :  { %v948_v57 = vpop.eup %947 }
 0x6a3   :  { %v331_v58 = vadd.f32 1.0, %v948_v57 }
 0x6a5   :  { %949 = vrcp.f32 %v331_v58 }
 0x6af   :  { %v950_v59 = vpop.eup %949 }
 0x6b0   :  { %v335_v62 = vmul.f32 %v950_v59, %v272_v42 }
 0x713   :  { %v338_v60 = vpop.permute.xlu0 %337 }
 0x714   :  { %v340_v61 = vmul.f32 %v950_v59, %v338_v60 }
 0x716   :  { %342 = vrot.lane.b32.xlu1 %v340_v61, %s1089_s17 }
 0x788   :  { %v343_v63 = vpop.permute.xlu1 %342 }
 0x789   :  { %v345_v3 = vadd.f32 %v343_v63, %v335_v62 }
 0x78b   :  { %951 = vtanh.f32 %v345_v3 }
 0x795   :  { %v952_v4 = vpop.eup %951 }
 0x796   :  { %348 = vrot.lane.b32.xlu0 %v952_v4, %s1084_s1 }
 0x808   :  { %v349_v5 = vpop.permute.xlu0 %348 }
 0x809   :  { %v351_v6 = vmul.f32 %v950_v59, %v349_v5 }
 0x80b   :  { %v353_v7 = vpack.c.bf16 %v351_v6, %v351_v6 }
 0x80d   :  { %355 = vrot.lane.b32.xlu1 %v353_v7, %s1089_s17 }
 0x87f   :  { %v356_v9 = vpop.permute.xlu1 %355 }
 0x880   :  { %880 = vmatmul.mubr.msk.bf16.vlgmr.msra.gmra.mrb[4].mxu1 %vm137_vm1, %v356_v9 }
 0x881   :  { %892 = vmatpush3.bf16.msra.mxu1 %v1146_v1  ;;  %895 = vmatprep.mubr.msk.bf16.mxu1 %vm1087_vm0, %v1086_v0 }
 0x882   :  { %893 = vmatprep.subr.bf16.mxu1 %v1086_v0 }
 0x885   :  { %894 = vmatpush3.bf16.msra.mxu1 %v1149_v2 }
 0x886   :  { %907 = vmatprep.subr.bf16.mxu1 %v1086_v0 }
 0x953   :  { %v394_v11 = vpop.f32.mrb[4].mxu1 }
 0x954   :  { %v400_v12 = vadd.f32 %v394_v11, %v352_v10  ;;  %v881_v13 = vpop.f32.mrb[5].mxu1  ;;  %v109_v10 = vld [vmem:[%s108_s28] sm:$0x1] }
 0x955   :  { %v397_v14 = vpop.f32.mrb[6].mxu1  ;;  %110 = vst [vmem:[#allocation2 + $0x6] sm:$0x1] %v109_v10 }
 0x956   :  { %953 = vtanh.f32 %v400_v12  ;;  %v882_v15 = vpop.f32.mrb[7].mxu1  ;;  %v802_v17 = vmul.f32 -1.442695, %v400_v12 }
 0x958   :  { %955 = vpow2.f32 %v802_v17 }
 0x95c   :  { %v571_v12 = vld [vmem:[#allocation2 + $0x6] sm:$0x1] }
 0x960   :  { %v954_v16 = vpop.eup %953 }
 0x961   :  { %410 = vrot.lane.b32.xlu0 %v954_v16, %s1084_s1 }
 0x962   :  { %v956_v18 = vpop.eup %955 }
 0x963   :  { %v404_v19 = vadd.f32 1.0, %v956_v18 }
 0x965   :  { %957 = vrcp.f32 %v404_v19 }
 0x96f   :  { %v958_v20 = vpop.eup %957 }
 0x970   :  { %v408_v23 = vmul.f32 %v958_v20, %v345_v3 }
 0x9d3   :  { %v411_v21 = vpop.permute.xlu0 %410 }
 0x9d4   :  { %v413_v22 = vmul.f32 %v958_v20, %v411_v21 }
 0x9d6   :  { %415 = vrot.lane.b32.xlu1 %v413_v22, %s1089_s17 }
 0xa48   :  { %v416_v24 = vpop.permute.xlu1 %415 }
 0xa49   :  { %v418_v25 = vadd.f32 %v416_v24, %v408_v23 }
 0xa4b   :  { %959 = vtanh.f32 %v418_v25 }
 0xa55   :  { %v960_v26 = vpop.eup %959 }
 0xa56   :  { %421 = vrot.lane.b32.xlu0 %v960_v26, %s1084_s1 }
 0xac8   :  { %v422_v27 = vpop.permute.xlu0 %421 }
 0xac9   :  { %v424_v28 = vmul.f32 %v958_v20, %v422_v27 }
 0xacb   :  { %v426_v29 = vpack.c.bf16 %v424_v28, %v424_v28 }
 0xacd   :  { %428 = vrot.lane.b32.xlu1 %v426_v29, %s1089_s17 }
 0xb3f   :  { %v429_v31 = vpop.permute.xlu1 %428 }
 0xb40   :  { %888 = vmatmul.mubr.msk.bf16.vlgmr.msra.gmra.mrb[8].mxu0 %vm137_vm1, %v429_v31 }
 0xb41   :  { %900 = vmatpush3.bf16.msra.mxu0 %v1146_v1  ;;  %903 = vmatprep.mubr.msk.bf16.mxu0 %vm1087_vm0, %v1086_v0 }
 0xb42   :  { %901 = vmatprep.subr.bf16.mxu0 %v1086_v0 }
 0xb45   :  { %902 = vmatpush3.bf16.msra.mxu0 %v1149_v2 }
 0xc13   :  { %v467_v33 = vpop.f32.mrb[8].mxu0 }
 0xc14   :  { %v473_v34 = vadd.f32 %v467_v33, %v425_v32  ;;  %v889_v35 = vpop.f32.mrb[9].mxu0  ;;  %v118_v32 = vld [vmem:[%s117_s30] sm:$0x1] }
 0xc15   :  { %v470_v36 = vpop.f32.mrb[10].mxu0  ;;  %119 = vst [vmem:[#allocation2 + $0x7] sm:$0x1] %v118_v32 }
 0xc16   :  { %961 = vtanh.f32 %v473_v34  ;;  %v890_v37 = vpop.f32.mrb[11].mxu0  ;;  %v804_v39 = vmul.f32 -1.442695, %v473_v34 }
 0xc18   :  { %963 = vpow2.f32 %v804_v39 }
 0xc1c   :  { %v644_v34 = vld [vmem:[#allocation2 + $0x7] sm:$0x1] }
 0xc20   :  { %v962_v38 = vpop.eup %961 }
 0xc21   :  { %483 = vrot.lane.b32.xlu0 %v962_v38, %s1084_s1 }
 0xc22   :  { %v964_v40 = vpop.eup %963 }
 0xc23   :  { %v477_v41 = vadd.f32 1.0, %v964_v40 }
 0xc25   :  { %965 = vrcp.f32 %v477_v41 }
 0xc2f   :  { %v966_v42 = vpop.eup %965 }
 0xc30   :  { %v481_v45 = vmul.f32 %v966_v42, %v418_v25 }
 0xc93   :  { %v484_v43 = vpop.permute.xlu0 %483 }
 0xc94   :  { %v486_v44 = vmul.f32 %v966_v42, %v484_v43 }
 0xc96   :  { %488 = vrot.lane.b32.xlu1 %v486_v44, %s1089_s17 }
 0xd08   :  { %v489_v46 = vpop.permute.xlu1 %488 }
 0xd09   :  { %v491_v47 = vadd.f32 %v489_v46, %v481_v45 }
 0xd0b   :  { %967 = vtanh.f32 %v491_v47 }
 0xd15   :  { %v968_v48 = vpop.eup %967 }
 0xd16   :  { %494 = vrot.lane.b32.xlu0 %v968_v48, %s1084_s1 }
 0xd88   :  { %v495_v49 = vpop.permute.xlu0 %494 }
 0xd89   :  { %v497_v50 = vmul.f32 %v966_v42, %v495_v49 }
 0xd8b   :  { %v499_v51 = vpack.c.bf16 %v497_v50, %v497_v50 }
 0xd8d   :  { %501 = vrot.lane.b32.xlu1 %v499_v51, %s1089_s17 }
 0xdff   :  { %v502_v53 = vpop.permute.xlu1 %501 }
 0xe00   :  { %896 = vmatmul.mubr.msk.bf16.vlgmr.msra.gmra.mrb[8].mxu1 %vm137_vm1, %v502_v53 }
 0xe01   :  { %908 = vmatpush3.bf16.msra.mxu1 %v1146_v1  ;;  %911 = vmatprep.mubr.msk.bf16.mxu1 %vm1087_vm0, %v1086_v0 }
 0xe02   :  { %909 = vmatprep.subr.bf16.mxu1 %v1086_v0 }
 0xe05   :  { %910 = vmatpush3.bf16.msra.mxu1 %v1149_v2 }
 0xed3   :  { %v540_v55 = vpop.f32.mrb[8].mxu1 }
 0xed4   :  { %v546_v56 = vadd.f32 %v540_v55, %v498_v54  ;;  %v897_v57 = vpop.f32.mrb[9].mxu1 }
 0xed5   :  { %v543_v58 = vpop.f32.mrb[10].mxu1 }
 0xed6   :  { %969 = vtanh.f32 %v546_v56  ;;  %v898_v59 = vpop.f32.mrb[11].mxu1  ;;  %v806_v61 = vmul.f32 -1.442695, %v546_v56 }
 0xed8   :  { %971 = vpow2.f32 %v806_v61 }
 0xee0   :  { %v970_v60 = vpop.eup %969 }
 0xee1   :  { %556 = vrot.lane.b32.xlu0 %v970_v60, %s1084_s1 }
 0xee2   :  { %v972_v1 = vpop.eup %971 }
 0xee3   :  { %v550_v62 = vadd.f32 1.0, %v972_v1 }
 0xee5   :  { %973 = vrcp.f32 %v550_v62 }
 0xeef   :  { %v974_v63 = vpop.eup %973 }
 0xef0   :  { %v554_v2 = vmul.f32 %v974_v63, %v491_v47 }
 0xf53   :  { %v557_v3 = vpop.permute.xlu0 %556 }
 0xf54   :  { %v559_v0 = vmul.f32 %v974_v63, %v557_v3 }
 0xf56   :  { %561 = vrot.lane.b32.xlu1 %v559_v0, %s1089_s17 }
 0xfc8   :  { %v562_v4 = vpop.permute.xlu1 %561 }
 0xfc9   :  { %v564_v5 = vadd.f32 %v562_v4, %v554_v2 }
 0xfcb   :  { %975 = vtanh.f32 %v564_v5 }
 0xfd5   :  { %v976_v6 = vpop.eup %975 }
 0xfd6   :  { %567 = vrot.lane.b32.xlu0 %v976_v6, %s1084_s1 }
0x1048   :  { %v568_v7 = vpop.permute.xlu0 %567 }
0x1049   :  { %v570_v8 = vmul.f32 %v974_v63, %v568_v7 }
0x104b   :  { %v572_v9 = vpack.c.bf16 %v570_v8, %v570_v8 }
0x104d   :  { %574 = vrot.lane.b32.xlu1 %v572_v9, %s1089_s17 }
0x10bf   :  { %v575_v11 = vpop.permute.xlu1 %574 }
0x10c0   :  { %904 = vmatmul.mubr.msk.bf16.vlgmr.msra.gmra.mrb[12].mxu0 %vm137_vm1, %v575_v11 }
0x1193   :  { %v613_v13 = vpop.f32.mrb[12].mxu0 }
0x1194   :  { %v619_v14 = vadd.f32 %v613_v13, %v571_v12  ;;  %v905_v15 = vpop.f32.mrb[13].mxu0 }
0x1195   :  { %v616_v16 = vpop.f32.mrb[14].mxu0 }
0x1196   :  { %977 = vtanh.f32 %v619_v14  ;;  %v906_v17 = vpop.f32.mrb[15].mxu0  ;;  %v808_v19 = vmul.f32 -1.442695, %v619_v14 }
0x1198   :  { %979 = vpow2.f32 %v808_v19 }
0x11a0   :  { %v978_v18 = vpop.eup %977 }
0x11a1   :  { %629 = vrot.lane.b32.xlu0 %v978_v18, %s1084_s1 }
0x11a2   :  { %v980_v20 = vpop.eup %979 }
0x11a3   :  { %v623_v21 = vadd.f32 1.0, %v980_v20 }
0x11a5   :  { %981 = vrcp.f32 %v623_v21 }
0x11af   :  { %v982_v22 = vpop.eup %981 }
0x11b0   :  { %v627_v25 = vmul.f32 %v982_v22, %v564_v5 }
0x1213   :  { %v630_v23 = vpop.permute.xlu0 %629 }
0x1214   :  { %v632_v24 = vmul.f32 %v982_v22, %v630_v23 }
0x1216   :  { %634 = vrot.lane.b32.xlu1 %v632_v24, %s1089_s17 }
0x1288   :  { %v635_v26 = vpop.permute.xlu1 %634 }
0x1289   :  { %v637_v27 = vadd.f32 %v635_v26, %v627_v25 }
0x128b   :  { %983 = vtanh.f32 %v637_v27 }
0x1295   :  { %v984_v28 = vpop.eup %983 }
0x1296   :  { %640 = vrot.lane.b32.xlu0 %v984_v28, %s1084_s1 }
0x1308   :  { %v641_v29 = vpop.permute.xlu0 %640 }
0x1309   :  { %v643_v30 = vmul.f32 %v982_v22, %v641_v29 }
0x130b   :  { %v645_v31 = vpack.c.bf16 %v643_v30, %v643_v30 }
0x130d   :  { %647 = vrot.lane.b32.xlu1 %v645_v31, %s1089_s17 }
0x137f   :  { %v648_v33 = vpop.permute.xlu1 %647 }
0x1380   :  { %912 = vmatmul.mubr.msk.bf16.vlgmr.msra.gmra.mrb[12].mxu1 %vm137_vm1, %v648_v33 }
0x1453   :  { %v686_v35 = vpop.f32.mrb[12].mxu1 }
0x1454   :  { %v692_v36 = vadd.f32 %v686_v35, %v644_v34  ;;  %v913_v37 = vpop.f32.mrb[13].mxu1 }
0x1455   :  { %v689_v38 = vpop.f32.mrb[14].mxu1 }
0x1456   :  { %985 = vtanh.f32 %v692_v36  ;;  %v914_v39 = vpop.f32.mrb[15].mxu1  ;;  %v810_v41 = vmul.f32 -1.442695, %v692_v36 }
0x1458   :  { %987 = vpow2.f32 %v810_v41 }
0x1460   :  { %v986_v40 = vpop.eup %985 }
0x1461   :  { %702 = vrot.lane.b32.xlu0 %v986_v40, %s1084_s1 }
0x1462   :  { %v988_v42 = vpop.eup %987 }
0x1463   :  { %v696_v43 = vadd.f32 1.0, %v988_v42 }
0x1465   :  { %989 = vrcp.f32 %v696_v43 }
0x146f   :  { %v990_v44 = vpop.eup %989 }
0x1470   :  { %v700_v47 = vmul.f32 %v990_v44, %v637_v27 }
0x14d3   :  { %v703_v45 = vpop.permute.xlu0 %702 }
0x14d4   :  { %v705_v46 = vmul.f32 %v990_v44, %v703_v45 }
0x14d6   :  { %707 = vrot.lane.b32.xlu1 %v705_v46, %s1089_s17 }
0x1548   :  { %v708_v48 = vpop.permute.xlu1 %707 }
0x1549   :  { %v710_v49 = vadd.f32 %v708_v48, %v700_v47 }
0x154b   :  { %991 = vtanh.f32 %v710_v49 }
0x1555   :  { %v992_v50 = vpop.eup %991 }
0x1556   :  { %713 = vrot.lane.b32.xlu0 %v992_v50, %s1084_s1 }
0x15c8   :  { %v714_v51 = vpop.permute.xlu0 %713 }
0x15c9   :  { %v716_v52 = vmul.f32 %v990_v44, %v714_v51 }
0x15cb   :  { %718 = vrot.lane.b32.xlu1 %v716_v52, %s1089_s17 }
0x163d   :  { %v719_v53 = vpop.permute.xlu1 %718 }
0x163e   :  { %722 = vst.msk [vmem:[#allocation10] sm:$0x1] %vm721_vm2, %v719_v53 }
0x163f   :  { %1060 = shalt.err (!%p1057_p13)
}
0x1640   :  { %s1061_s10 = scalar_lea.hbm %s1246_s3, 16 }
0x1641   :  { %p1062_p0 = scmp.ne.s32.totalorder %s1246_s3, %s1061_s10  ;;  %p1065_p1 = scmp.lt.u32.totalorder %s1061_s10, %s1246_s3 }
0x1643   :  { %p1067_p2 = pnand %p1065_p1, %p1062_p0 }
0x1645   :  { %1070 = shalt.err (!%p1067_p2)
}
0x1646   :  { %732 = dma.vmem_to_hbm [thread:$0]  %s730_s5, 16, %s1246_s3, [#allocation7]  }
0x1647   :  { %1077 = dma.done.wait [#allocation7], 16  }
0x1648   :  { %1078 = vsyncadd [#allocation7], 4294967280 }
0x1649   :  { %736 = vsyncpa [#allocation6], 1 }
0x164a   :  { %737 = vsyncpa [#allocation9], 1 }
0x164b   :  { %738 = vsyncpa [#allocation7], 1 }

</bundles_post_ra>
